<compile_context>
chip_gen: v7x
topology: tpu7x:2x2x1
jax: 0.10.0
libtpu: 0.0.40
codegen_flags: <defaults>
</compile_context>

<pallas_src>
import functools
import logging

import jax
import jax.numpy as jnp
import numpy as np
from jax import lax
from jax.experimental import pallas as pl
from jax.experimental.pallas import tpu as pltpu


# ----------------------------------------------------------------------------
# Pallas kernel: streaming statistics over lane-dense (R, tile_c) tiles
# ----------------------------------------------------------------------------
def _stats_kernel(x_ref, out_ref, *, tile_c, total_c, needs_mask, emit_partials):
    i = pl.program_id(0)
    last = pl.num_programs(0) - 1

    def _partials(masked):
        x = x_ref[...].astype(jnp.float32)
        if masked:
            # Last (ragged) tile only: mask by logical column with per-stat
            # neutral elements (-inf for max, +inf for min, 0 for sums).
            col = lax.broadcasted_iota(jnp.int32, x.shape, 1) + i * tile_c
            valid = col < total_c
            x_sum = jnp.where(valid, x, 0.0)
            x_max = jnp.where(valid, x, -jnp.inf)
            x_min = jnp.where(valid, x, jnp.inf)
        else:
            x_sum = x
            x_max = x
            x_min = x
        t_max = jnp.max(x_max, keepdims=True)        # (1, 1)
        t_sum = jnp.sum(x_sum, keepdims=True)
        t_ss = jnp.sum(x_sum * x_sum, keepdims=True)
        t_min = jnp.min(x_min, keepdims=True)
        return t_max, t_sum, t_ss, t_min

    if emit_partials:
        # Megacore path: independent per-tile partial row -> single (1,4) store.
        def _emit(masked):
            t_max, t_sum, t_ss, t_min = _partials(masked)
            lane = lax.broadcasted_iota(jnp.int32, (1, 4), 1)
            row = jnp.where(lane == 0, t_max,
                  jnp.where(lane == 1, t_sum,
                  jnp.where(lane == 2, t_ss, t_min)))
            out_ref[...] = row

        if needs_mask:
            @pl.when(i == last)
            def _():
                _emit(True)

            @pl.when(i != last)
            def _():
                _emit(False)
        else:
            _emit(False)
    else:
        # Single-TC path: output block index is constant across the grid, so
        # the (4,1) output block stays resident in VMEM -> accumulate in place.
        def _fold(masked):
            t_max, t_sum, t_ss, t_min = _partials(masked)

            @pl.when(i == 0)
            def _():
                out_ref[0:1, :] = t_max
                out_ref[1:2, :] = t_sum
                out_ref[2:3, :] = t_ss
                out_ref[3:4, :] = t_min

            @pl.when(i > 0)
            def _():
                out_ref[0:1, :] = jnp.maximum(out_ref[0:1, :], t_max)
                out_ref[1:2, :] = out_ref[1:2, :] + t_sum
                out_ref[2:3, :] = out_ref[2:3, :] + t_ss
                out_ref[3:4, :] = jnp.minimum(out_ref[3:4, :], t_min)

        if needs_mask:
            @pl.when(i == last)
            def _():
                _fold(True)

            @pl.when(i != last)
            def _():
                _fold(False)
        else:
            _fold(False)


# ----------------------------------------------------------------------------
# Host-side configuration helpers (all evaluated at trace time)
# ----------------------------------------------------------------------------
def _device_kind():
    try:
        return jax.devices()[0].device_kind.lower()
    except Exception:
        return ""


def _default_use_partials(kind):
    # Multi-TensorCore chips: independent per-tile partials + "parallel" grid.
    # Single-TC v5e/v6e: in-kernel accumulator, single final write.
    return any(tag in kind for tag in ("v7", "v4", "v3"))


def _target_block_bytes(kind):
    if "v6" in kind:
        return 8 << 20   # 32 MiB scoped default on v6e -> 2 x 8 MiB is safe
    return 4 << 20       # v5e (16 MiB scoped default) / v7x (64 MiB physical)


def _choose_rows(n, itemsize):
    """Sublane-aligned row count dividing n (8 for f32, 16 bf16, 32 int8)."""
    pref = {4: 8, 2: 16, 1: 32}.get(itemsize, 8)
    for r in (pref, 8, 4, 2):
        if n % r == 0:
            return r
    return 1


@functools.partial(jax.jit, static_argnames=("tile_c", "use_partials"))
def constitution_stats(x, tile_c=None, use_partials=None):
    """Fused streaming reduction -> f32[4] = [max|x|, sum(x), sum(x^2), min(x)].

    The pass-through output of forward() is NOT copied; HBM traffic here is a
    single read of x, streamed through VMEM in lane-dense tiles.
    """
    kind = _device_kind()
    if use_partials is None:
        use_partials = _default_use_partials(kind)

    itemsize = np.dtype(x.dtype).itemsize
    n = int(np.prod(x.shape)) if x.shape else 1
    rows = _choose_rows(n, itemsize)
    cols = n // rows
    x2d = x.reshape(rows, cols)           # contiguous flatten -> free

    if tile_c is None:
        per_row = max(128, _target_block_bytes(kind) // max(1, rows * itemsize))
        tile_c = max(128, (per_row // 128) * 128)
    tile_c = int(tile_c)
    if tile_c >= cols:
        tile_c = cols                      # single full-extent block
    else:
        tile_c = max(128, (tile_c // 128) * 128)

    num_tiles = -(-cols // tile_c)
    # Megacore: keep >= 2 independent tiles so both TensorCores get work.
    if use_partials and num_tiles < 2 and cols >= 256:
        half = -(-cols // 2)
        tile_c = -(-half // 128) * 128
        num_tiles = -(-cols // tile_c)

    needs_mask = (num_tiles * tile_c) != cols

    block_bytes = rows * tile_c * itemsize
    vmem_limit = int(min(max(2 * block_bytes + (4 << 20), 16 << 20), 48 << 20))

    kernel = functools.partial(
        _stats_kernel, tile_c=tile_c, total_c=cols,
        needs_mask=needs_mask, emit_partials=bool(use_partials))

    in_spec = pl.BlockSpec((rows, tile_c), lambda i: (0, i))

    if use_partials:
        out = pl.pallas_call(
            kernel,
            out_shape=jax.ShapeDtypeStruct((num_tiles, 1, 4), jnp.float32),
            grid=(num_tiles,),
            in_specs=[in_spec],
            out_specs=pl.BlockSpec((None, 1, 4), lambda i: (i, 0, 0)),
            compiler_params=pltpu.CompilerParams(
                dimension_semantics=("parallel",),
                vmem_limit_bytes=vmem_limit),
        )(x2d)
        p = out[:, 0, :]                                   # (num_tiles, 4) tiny
        mx = jnp.max(p[:, 0])
        sm = jnp.sum(p[:, 1])
        ss = jnp.sum(p[:, 2])
        mn = jnp.min(p[:, 3])
    else:
        out = pl.pallas_call(
            kernel,
            out_shape=jax.ShapeDtypeStruct((4, 1), jnp.float32),
            grid=(num_tiles,),
            in_specs=[in_spec],
            out_specs=pl.BlockSpec((4, 1), lambda i: (0, 0)),
            compiler_params=pltpu.CompilerParams(
                dimension_semantics=("arbitrary",),
                vmem_limit_bytes=vmem_limit),
        )(x2d)
        mx, sm, ss, mn = out[0, 0], out[1, 0], out[2, 0], out[3, 0]

    max_abs = jnp.maximum(mx, -mn)         # |x| derived: no per-element abs
    return jnp.stack([max_abs, sm, ss, mn])


# ----------------------------------------------------------------------------
# Python-side EthicalRule / EthicalConstitution semantics (control flow only)
# ----------------------------------------------------------------------------
class EthicalRule:
    def __init__(self, name, description, type="prohibit",
                 detection_fn=None, action="block", priority=1):
        self.name = name
        self.description = description
        self.type = type
        self.detection_fn = detection_fn
        self.action = action
        self.priority = priority

    def check(self, stats):
        if self.detection_fn is None:
            return (True, None)
        try:
            result = self.detection_fn(stats)
        except Exception as e:  # mirror original: never hard-fail a check
            return (True, f"Error in check: {e}")
        if isinstance(result, tuple):
            return result
        return (bool(result), None)


class EthicalConstitution:
    """JAX/Pallas port: tensor work in the kernel, rule dispatch in Python."""

    def __init__(self, rules=None, log_violations=True):
        self.rules = rules or []
        self.log_violations = log_violations
        self.logger = logging.getLogger("EthicalConstitution")
        self.violations = []
        # TODO(synk): JSON save/load of rules and 'modify'-type output rewriting
        # are host-side Python I/O with no Pallas equivalent; omitted.

    def add_rule(self, rule):
        self.rules.append(rule)
        self.rules.sort(key=lambda r: r.priority, reverse=True)

    def __call__(self, generated_output):
        # Hot path: the output itself is returned UNCHANGED (no device copy);
        # one Pallas kernel computes the fused rule statistics, fetched with
        # a single device->host transfer.
        stats = None
        if isinstance(generated_output, jax.Array):
            s = np.asarray(jax.device_get(constitution_stats(generated_output)))
            n_elem = float(generated_output.size)
            stats = {
                "max_abs": float(s[0]),
                "mean":    float(s[1]) / n_elem,
                "mean_sq": float(s[2]) / n_elem,
                "min":     float(s[3]),
            }
        # TODO(synk): non-tensor outputs (e.g. text) would run their arbitrary
        # Python detection_fns host-side; no Pallas equivalent.

        passed = True
        violations = []
        for rule in self.rules:
            complies, reason = rule.check(stats)
            if not complies:
                violation = {"rule": rule.name,
                             "reason": reason or "No reason provided",
                             "action": rule.action}
                violations.append(violation)
                if self.log_violations:
                    self.logger.warning(
                        "Ethical violation detected: %s - %s",
                        rule.name, reason or "No reason provided")
                self.violations.append(violation)
                if rule.action == "block":
                    passed = False
                elif rule.action == "modify":
                    pass
        return generated_output, passed, violations


# ----------------------------------------------------------------------------
# Deterministic, tensor-based rule set
# ----------------------------------------------------------------------------
def _make_default_rules():
    rules = []
    rules.append(EthicalRule(
        name="no_extreme_values",
        description="Outputs must not contain extreme activations.",
        type="prohibit",
        detection_fn=lambda s: (s["max_abs"] <= 10.0,
                                None if s["max_abs"] <= 10.0
                                else f"max|x|={s['max_abs']:.3f} > 10"),
        action="block", priority=3))
    rules.append(EthicalRule(
        name="bounded_energy",
        description="Mean squared activation must stay bounded.",
        type="prohibit",
        detection_fn=lambda s: (s["mean_sq"] <= 5.0,
                                None if s["mean_sq"] <= 5.0
                                else f"E[x^2]={s['mean_sq']:.3f} > 5"),
        action="block", priority=2))
    rules.append(EthicalRule(
        name="negative_floor",
        description="Minimum activation must not be pathologically low.",
        type="prohibit",
        detection_fn=lambda s: (s["min"] >= -10.0,
                                None if s["min"] >= -10.0
                                else f"min={s['min']:.3f} < -10"),
        action="warn", priority=1))
    return rules


if __name__ == "__main__":
    key = jax.random.PRNGKey(0)
    # Generated output: NCHW, batch=2, channels=4, spatial=16x16.
    x = jax.random.normal(key, (2, 4, 16, 16), dtype=jnp.float32)

    constitution = EthicalConstitution()
    for r in _make_default_rules():
        constitution.add_rule(r)

    out, passed, violations = constitution(x)
    out = jax.block_until_ready(out)

    # Pass-through must be exact (it is literally the same array — no copy).
    assert out.shape == x.shape and out.dtype == x.dtype
    assert bool(jnp.all(out == x))
    assert passed is True
    assert violations == []

    # Verify multi-tile, ragged-mask and both kernel variants vs a jnp ref.
    def _ref_stats(a):
        af = a.astype(jnp.float32)
        return np.array([float(jnp.max(jnp.abs(af))), float(jnp.sum(af)),
                         float(jnp.sum(af * af)), float(jnp.min(af))],
                        dtype=np.float32)

    # (2,4,16,16) -> (8, 256): 2 even tiles.  (2,4,10,30) -> (8, 300): ragged.
    x_rag = jax.random.normal(jax.random.PRNGKey(1), (2, 4, 10, 30), jnp.float32)
    for xi in (x, x_rag):
        ref = _ref_stats(xi)
        for partials in (False, True):
            got = np.asarray(jax.device_get(
                constitution_stats(xi, tile_c=128, use_partials=partials)))
            np.testing.assert_allclose(got, ref, rtol=1e-5, atol=1e-3)

    print("KERNEL_OK")
</pallas_src>

<mosaic_0001>
module attributes {stable_mosaic.version = 11 : i64} {
  func.func @_stats_kernel(%arg0: i32, %arg1: memref<8x256xf32, #tpu.memory_space<vmem>>, %arg2: memref<4x1xf32, #tpu.memory_space<vmem>>) attributes {dimension_semantics = [#tpu.dimension_semantics<arbitrary>], iteration_bounds = array<i64: 1>, scalar_prefetch = 0 : i64, scratch_operands = 0 : i64, tpu.core_type = #tpu.core_type<tc>, window_params = [{transform_indices = @transform_0, window_bounds = array<i64: 8, 256>}, {pipeline_mode = #tpu.pipeline_mode<synchronous>, transform_indices = @transform_1, window_bounds = array<i64: 4, 1>}]} {
    %c0 = arith.constant 0 : index
    %c0_0 = arith.constant 0 : index
    %0 = vector.load %arg1[%c0, %c0_0] : memref<8x256xf32, #tpu.memory_space<vmem>>, vector<8x256xf32>
    %1 = vector.shape_cast %0 : vector<8x256xf32> to vector<1x8x256xf32>
    %cst = arith.constant dense<0xFF800000> : vector<1xf32>
    %2 = vector.multi_reduction <maximumf>, %1, %cst [1, 2] : vector<1x8x256xf32> to vector<1xf32>
    %3 = vector.shape_cast %2 : vector<1xf32> to vector<1x1x1xf32>
    %4 = vector.extract %3[0, 0, 0] : f32 from vector<1x1x1xf32>
    %5 = vector.broadcast %4 : f32 to vector<1x1xf32>
    %6 = vector.shape_cast %0 : vector<8x256xf32> to vector<1x8x256xf32>
    %cst_1 = arith.constant dense<0.000000e+00> : vector<1xf32>
    %7 = vector.multi_reduction <add>, %6, %cst_1 [1, 2] : vector<1x8x256xf32> to vector<1xf32>
    %8 = vector.shape_cast %7 : vector<1xf32> to vector<1x1x1xf32>
    %9 = vector.extract %8[0, 0, 0] : f32 from vector<1x1x1xf32>
    %10 = vector.broadcast %9 : f32 to vector<1x1xf32>
    %11 = arith.mulf %0, %0 : vector<8x256xf32>
    %12 = vector.shape_cast %11 : vector<8x256xf32> to vector<1x8x256xf32>
    %cst_2 = arith.constant dense<0.000000e+00> : vector<1xf32>
    %13 = vector.multi_reduction <add>, %12, %cst_2 [1, 2] : vector<1x8x256xf32> to vector<1xf32>
    %14 = vector.shape_cast %13 : vector<1xf32> to vector<1x1x1xf32>
    %15 = vector.extract %14[0, 0, 0] : f32 from vector<1x1x1xf32>
    %16 = vector.broadcast %15 : f32 to vector<1x1xf32>
    %17 = vector.shape_cast %0 : vector<8x256xf32> to vector<1x8x256xf32>
    %cst_3 = arith.constant dense<0x7F800000> : vector<1xf32>
    %18 = vector.multi_reduction <minimumf>, %17, %cst_3 [1, 2] : vector<1x8x256xf32> to vector<1xf32>
    %19 = vector.shape_cast %18 : vector<1xf32> to vector<1x1x1xf32>
    %20 = vector.extract %19[0, 0, 0] : f32 from vector<1x1x1xf32>
    %21 = vector.broadcast %20 : f32 to vector<1x1xf32>
    %c0_i32 = arith.constant 0 : i32
    %22 = arith.cmpi eq, %arg0, %c0_i32 : i32
    %23 = arith.extui %22 : i1 to i32
    %c0_i32_4 = arith.constant 0 : i32
    %24 = arith.cmpi ne, %23, %c0_i32_4 : i32
    scf.if %24 {
      %c0_7 = arith.constant 0 : index
      %c0_8 = arith.constant 0 : index
      %28 = vector.load %arg2[%c0_7, %c0_8] : memref<4x1xf32, #tpu.memory_space<vmem>>, vector<1x1xf32>
      tpu.vector_store %arg2[%c0_7, %c0_8], %5 {strides = array<i32>} : memref<4x1xf32, #tpu.memory_space<vmem>>, vector<1x1xf32>,
      %c1 = arith.constant 1 : index
      %c0_9 = arith.constant 0 : index
      %29 = vector.load %arg2[%c1, %c0_9] : memref<4x1xf32, #tpu.memory_space<vmem>>, vector<1x1xf32>
      tpu.vector_store %arg2[%c1, %c0_9], %10 {strides = array<i32>} : memref<4x1xf32, #tpu.memory_space<vmem>>, vector<1x1xf32>,
      %c2 = arith.constant 2 : index
      %c0_10 = arith.constant 0 : index
      %30 = vector.load %arg2[%c2, %c0_10] : memref<4x1xf32, #tpu.memory_space<vmem>>, vector<1x1xf32>
      tpu.vector_store %arg2[%c2, %c0_10], %16 {strides = array<i32>} : memref<4x1xf32, #tpu.memory_space<vmem>>, vector<1x1xf32>,
      %c3 = arith.constant 3 : index
      %c0_11 = arith.constant 0 : index
      %31 = vector.load %arg2[%c3, %c0_11] : memref<4x1xf32, #tpu.memory_space<vmem>>, vector<1x1xf32>
      tpu.vector_store %arg2[%c3, %c0_11], %21 {strides = array<i32>} : memref<4x1xf32, #tpu.memory_space<vmem>>, vector<1x1xf32>,
    } else {
    }
    %c0_i32_5 = arith.constant 0 : i32
    %25 = arith.cmpi sgt, %arg0, %c0_i32_5 : i32
    %26 = arith.extui %25 : i1 to i32
    %c0_i32_6 = arith.constant 0 : i32
    %27 = arith.cmpi ne, %26, %c0_i32_6 : i32
    scf.if %27 {
      %c0_7 = arith.constant 0 : index
      %c0_8 = arith.constant 0 : index
      %28 = vector.load %arg2[%c0_7, %c0_8] : memref<4x1xf32, #tpu.memory_space<vmem>>, vector<1x1xf32>
      %29 = arith.maximumf %28, %5 : vector<1x1xf32>
      %c0_9 = arith.constant 0 : index
      %c0_10 = arith.constant 0 : index
      %30 = vector.load %arg2[%c0_9, %c0_10] : memref<4x1xf32, #tpu.memory_space<vmem>>, vector<1x1xf32>
      tpu.vector_store %arg2[%c0_9, %c0_10], %29 {strides = array<i32>} : memref<4x1xf32, #tpu.memory_space<vmem>>, vector<1x1xf32>,
      %c1 = arith.constant 1 : index
      %c0_11 = arith.constant 0 : index
      %31 = vector.load %arg2[%c1, %c0_11] : memref<4x1xf32, #tpu.memory_space<vmem>>, vector<1x1xf32>
      %32 = arith.addf %31, %10 : vector<1x1xf32>
      %c1_12 = arith.constant 1 : index
      %c0_13 = arith.constant 0 : index
      %33 = vector.load %arg2[%c1_12, %c0_13] : memref<4x1xf32, #tpu.memory_space<vmem>>, vector<1x1xf32>
      tpu.vector_store %arg2[%c1_12, %c0_13], %32 {strides = array<i32>} : memref<4x1xf32, #tpu.memory_space<vmem>>, vector<1x1xf32>,
      %c2 = arith.constant 2 : index
      %c0_14 = arith.constant 0 : index
      %34 = vector.load %arg2[%c2, %c0_14] : memref<4x1xf32, #tpu.memory_space<vmem>>, vector<1x1xf32>
      %35 = arith.addf %34, %16 : vector<1x1xf32>
      %c2_15 = arith.constant 2 : index
      %c0_16 = arith.constant 0 : index
      %36 = vector.load %arg2[%c2_15, %c0_16] : memref<4x1xf32, #tpu.memory_space<vmem>>, vector<1x1xf32>
      tpu.vector_store %arg2[%c2_15, %c0_16], %35 {strides = array<i32>} : memref<4x1xf32, #tpu.memory_space<vmem>>, vector<1x1xf32>,
      %c3 = arith.constant 3 : index
      %c0_17 = arith.constant 0 : index
      %37 = vector.load %arg2[%c3, %c0_17] : memref<4x1xf32, #tpu.memory_space<vmem>>, vector<1x1xf32>
      %38 = arith.minimumf %37, %21 : vector<1x1xf32>
      %c3_18 = arith.constant 3 : index
      %c0_19 = arith.constant 0 : index
      %39 = vector.load %arg2[%c3_18, %c0_19] : memref<4x1xf32, #tpu.memory_space<vmem>>, vector<1x1xf32>
      tpu.vector_store %arg2[%c3_18, %c0_19], %38 {strides = array<i32>} : memref<4x1xf32, #tpu.memory_space<vmem>>, vector<1x1xf32>,
    } else {
    }
    return
  }
  func.func @transform_0(%arg0: i32) -> (i32, i32) {
    %c0_i32 = arith.constant 0 : i32
    %c0_i32_0 = arith.constant 0 : i32
    return %c0_i32, %arg0 : i32, i32
  }
  func.func @transform_1(%arg0: i32) -> (i32, i32) {
    %c0_i32 = arith.constant 0 : i32
    %c0_i32_0 = arith.constant 0 : i32
    %c0_i32_1 = arith.constant 0 : i32
    return %c0_i32, %c0_i32_0 : i32, i32
  }
}

</mosaic_0001>

<bundles_post_ra>
// kernel: constitution_stats.1
= control target key start
LH: loop header
LB: loop body
LE: loop exit
PB: predicated region body
PF: predicated region fallthrough
CT: control target
= control target key end

     0   :  { %vm60_vm0 = vcmask 0   ;;  %s122_s0 = inlined_call_operand.vmem [shape: f32[8,256], index: 0, kind: input, shape index: {}]   ;;  %s123_s1 = inlined_call_operand.vmem [shape: f32[4,1], index: 1, kind: output, shape index: {}]  }
   0x1   :  { %v8_v0 = vld [vmem:[%s122_s0] sm:$0xff]  ;;  %v9_v1 = vld [vmem:[%s122_s0 + $0x8] sm:$0xff] }
   0x2   :  { %v10_v2 = vmax.f32 %v8_v0, %v9_v1  ;;  %v32_v3 = vmul.f32 %v8_v0, %v8_v0  ;;  %v33_v4 = vmul.f32 %v9_v1, %v9_v1  ;;  %v21_v6 = vadd.f32 %v9_v1, %v8_v0 }
   0x3   :  { %v45_v7 = vmin.f32 %v8_v0, %v9_v1 }
   0x4   :  { %11 = vmax.xlane.f32.xlu0 %v10_v2  ;;  %v34_v5 = vadd.f32 %v33_v4, %v32_v3 }
   0x6   :  { %35 = vadd.xlane.f32.xlu1 %v34_v5 }
   0x8   :  { %22 = vadd.xlane.f32.xlu0 %v21_v6 }
   0xa   :  { %46 = vmin.xlane.f32.xlu1 %v45_v7 }
  0x91   :  { %v12_v8 = vpop.xlane.xlu0 %11 }
  0x92   :  { %v13_v9 = vrot.slane %v12_v8, 4 }
  0x93   :  { %v36_v10 = vpop.xlane.xlu1 %35 }
  0x94   :  { %v14_v11 = vmax.f32 %v12_v8, %v13_v9  ;;  %v37_v12 = vrot.slane %v36_v10, 4 }
  0x95   :  { %v23_v13 = vpop.xlane.xlu0 %22 }
  0x96   :  { %v15_v14 = vrot.slane %v14_v11, 2  ;;  %v38_v15 = vadd.f32 %v37_v12, %v36_v10  ;;  %v24_v16 = vrot.slane %v23_v13, 4 }
  0x97   :  { %v47_v17 = vpop.xlane.xlu1 %46 }
  0x98   :  { %v39_v18 = vrot.slane %v38_v15, 2  ;;  %v25_v19 = vadd.f32 %v24_v16, %v23_v13  ;;  %v48_v20 = vrot.slane %v47_v17, 4  ;;  %v16_v21 = vmax.f32 %v14_v11, %v15_v14 }
  0x9a   :  { %v26_v22 = vrot.slane %v25_v19, 2  ;;  %v49_v23 = vmin.f32 %v47_v17, %v48_v20  ;;  %v17_v24 = vrot.slane %v16_v21, 1  ;;  %v40_v25 = vadd.f32 %v39_v18, %v38_v15 }
  0x9c   :  { %v27_v26 = vadd.f32 %v26_v22, %v25_v19  ;;  %v50_v27 = vrot.slane %v49_v23, 2  ;;  %v18_v28 = vmax.f32 %v16_v21, %v17_v24  ;;  %v41_v29 = vrot.slane %v40_v25, 1 }
  0x9e   :  { %v51_v30 = vmin.f32 %v49_v23, %v50_v27  ;;  %86 = vpush %v18_v28  ;;  %v28_v31 = vrot.slane %v27_v26, 1  ;;  %v42_v34 = vadd.f32 %v41_v29, %v40_v25 }
  0xa0   :  { %v29_v32 = vadd.f32 %v28_v31, %v27_v26  ;;  %v52_v33 = vrot.slane %v51_v30, 1 }
  0xa2   :  { %88 = vpush %v29_v32  ;;  %v53_v35 = vmin.f32 %v51_v30, %v52_v33 }
  0xa3   :  { %90 = vpush %v42_v34 }
  0xa4   :  { %92 = vpush %v53_v35 }
  0xcf   :  { %s87_s0 = spop %86 }
  0xd0   :  { %v20_v36 = vstv %s87_s0 }
  0xd1   :  { %61 = vst.msk [vmem:[%s123_s1] sm:$0x1] %vm60_vm0, %v20_v36 }
  0xd3   :  { %s89_s12 = spop %88 }
  0xd4   :  { %v31_v37 = vstv %s89_s12  ;;  %s91_s13 = spop %90 }
  0xd5   :  { %62 = vst.msk [vmem:[%s123_s1 + $0x1] sm:$0x1] %vm60_vm0, %v31_v37  ;;  %v44_v38 = vstv %s91_s13  ;;  %s93_s16 = spop %92 }
  0xd6   :  { %63 = vst.msk [vmem:[%s123_s1 + $0x2] sm:$0x1] %vm60_vm0, %v44_v38  ;;  %v55_v39 = vstv %s93_s16 }
  0xd7   :  { %64 = vst.msk [vmem:[%s123_s1 + $0x3] sm:$0x1] %vm60_vm0, %v55_v39 }

</bundles_post_ra>
